<compile_context>
chip_gen: v6e
topology: v6e:2x2x1
jax: 0.10.0
libtpu: 0.0.40
codegen_flags: <defaults>
</compile_context>

<pallas_src>
import numpy as np
import jax
import jax.numpy as jnp
from jax import lax
from jax.experimental import pallas as pl
from jax.experimental.pallas import tpu as pltpu

DIST_MIN = 2.3125
DIST_MAX = 21.6875
N_BINS = 64          # unused by the loss value itself (only min/max gate the mask)
_PAD_BIAS = 1e8      # added to |x|^2 of padded residues -> d2 >> DIST_MAX^2


def _round_up(x, m):
    return ((x + m - 1) // m) * m


# ----------------------------------------------------------------------------
# Pallas kernel: one upper-triangle (i, j) tile per grid step.
#   grid = (B, n_tri); both axes 'parallel' (no carried state).
#   Inputs: fused bf16 operands; d2/r2 come from single-pass bf16 MXU matmuls.
#   Outputs: per-tile (sum of squared errors, count) scalars.
# ----------------------------------------------------------------------------
def _disto_kernel(i_tab_ref, j_tab_ref,       # scalar-prefetch (SMEM) tile tables
                  lhs_ref, rhs_ref,           # (1,2,T,K) / (1,2,K,T) bf16 operands
                  sq_ref, cnt_ref):           # (1,1,1,1) per-tile outputs
    t = pl.program_id(1)
    i = i_tab_ref[t]
    j = j_tab_ref[t]

    # d2[p,q] = |x_p - x_q|^2 (+1e8 bias for any pair touching a padded
    # residue), computed to ~f32 accuracy by the K-channel split packing.
    d2 = jnp.dot(lhs_ref[0, 0], rhs_ref[0, 0], preferred_element_type=jnp.float32)
    r2 = jnp.dot(lhs_ref[0, 1], rhs_ref[0, 1], preferred_element_type=jnp.float32)

    d = jnp.sqrt(jnp.maximum(d2, 0.0))
    r = jnp.sqrt(jnp.maximum(r2, 0.0))

    # Range gate on the ground-truth d^2 (equivalent to gating on d; also
    # rejects padded pairs via the +1e8 bias baked into the GT operands).
    m = ((d2 > DIST_MIN * DIST_MIN) & (d2 < DIST_MAX * DIST_MAX)).astype(jnp.float32)
    err = d - r

    # Off-diagonal tiles stand for both (i,j) and (j,i) -> weight 2.
    w = jnp.where(j > i, 2.0, 1.0).astype(jnp.float32)
    sq_ref[0, 0] = w * jnp.sum(m * (err * err), keepdims=True)
    cnt_ref[0, 0] = w * jnp.sum(m, keepdims=True)


# ----------------------------------------------------------------------------
# Operand packing: fold an (effectively) f32-precision squared-distance matmul
# into a single bf16 MXU pass by expanding the K dimension with 3-term bf16
# splits of every operand channel.
# ----------------------------------------------------------------------------
def _split3_bf16(a):
    """3-term bf16 split: a ~= a0 + a1 + a2 with ~2^-24 relative error."""
    a0 = a.astype(jnp.bfloat16)
    r = a - a0.astype(jnp.float32)
    a1 = r.astype(jnp.bfloat16)
    r = r - a1.astype(jnp.float32)
    a2 = r.astype(jnp.bfloat16)
    return a0, a1, a2


def _pack_mxu_operands(x, valid, pad_bias):
    """x: (B, Lp, 3) f32, valid: (B, Lp) f32.

    Returns bf16 operands L (B, Lp, 24) and R (B, 24, Lp) such that
    (L @ R)[p, q] = |x_p - x_q|^2 (+ pad_bias for any pair touching an invalid
    position) to ~f32 accuracy, using a single bf16 MXU pass (K = 24 <= MXU
    contraction size, so the split channels are free)."""
    sqn = jnp.sum(x * x, axis=-1) + pad_bias * (1.0 - valid)       # (B, Lp)
    ones = jnp.ones_like(sqn).astype(jnp.bfloat16)

    lhs_ch, rhs_ch = [], []
    # Cross terms: sum_c (-2 x_c)_p * (x_c)_q.  Keep the 6 significant products
    # of the 3-term splits (the bf16_6x decomposition), folded into K channels.
    for c in range(3):
        u0, u1, u2 = _split3_bf16(-2.0 * x[..., c])
        v0, v1, v2 = _split3_bf16(x[..., c])
        lhs_ch += [u0, u0, u1, u0, u2, u1]
        rhs_ch += [v0, v1, v0, v2, v0, v1]
    # |x_p|^2 * 1  and  1 * |x_q|^2  (1.0 is exact in bf16).
    s0, s1, s2 = _split3_bf16(sqn)
    lhs_ch += [s0, s1, s2, ones, ones, ones]
    rhs_ch += [ones, ones, ones, s0, s1, s2]

    lhs = jnp.stack(lhs_ch, axis=-1)        # (B, Lp, 24) bf16
    rhs = jnp.stack(rhs_ch, axis=1)         # (B, 24, Lp) bf16
    return lhs, rhs


def _masked_center(x, valid):
    """Subtract the mean of valid positions (distances are shift-invariant)."""
    w = valid[..., None]
    denom = jnp.maximum(jnp.sum(valid, axis=1, keepdims=True), 1.0)[..., None]
    return x - jnp.sum(x * w, axis=1, keepdims=True) / denom


def distogram_stats_pallas(ca, ca_rebuilt, valid, *, max_tile=512,
                           vmem_limit_bytes=48 * 1024 * 1024):
    """ca, ca_rebuilt: (B, L, 3) float32. valid: (B, L) float32 (1 = not padded).

    Returns (sum_of_squared_errors, count) over pairs that are (a) both valid
    and (b) whose ground-truth distance lies in (DIST_MIN, DIST_MAX)."""
    B, L, _ = ca.shape
    T = min(max_tile, _round_up(L, 128))
    Lp = _round_up(L, T)
    pad = Lp - L
    ca = jnp.pad(ca.astype(jnp.float32), ((0, 0), (0, pad), (0, 0)))
    ca_rebuilt = jnp.pad(ca_rebuilt.astype(jnp.float32), ((0, 0), (0, pad), (0, 0)))
    valid = jnp.pad(valid.astype(jnp.float32), ((0, 0), (0, pad)))

    ca = _masked_center(ca, valid)
    ca_rebuilt = _masked_center(ca_rebuilt, valid)

    gl_lhs, gl_rhs = _pack_mxu_operands(ca, valid, _PAD_BIAS)        # ground truth (biased)
    rl_lhs, rl_rhs = _pack_mxu_operands(ca_rebuilt, valid, 0.0)      # rebuilt

    # Fuse gt/rebuilt into single input streams (2 DMA streams instead of 4).
    lhs = jnp.stack([gl_lhs, rl_lhs], axis=1)    # (B, 2, Lp, K)
    rhs = jnp.stack([gl_rhs, rl_rhs], axis=1)    # (B, 2, K, Lp)
    K = lhs.shape[-1]

    nt = Lp // T
    # Packed upper-triangle tile enumeration -> no dead lower-triangle steps.
    ii, jj = np.triu_indices(nt)
    i_tab = jnp.asarray(ii, dtype=jnp.int32)
    j_tab = jnp.asarray(jj, dtype=jnp.int32)
    n_tri = int(ii.shape[0])

    sq, cnt = pl.pallas_call(
        _disto_kernel,
        out_shape=(jax.ShapeDtypeStruct((B, n_tri, 1, 1), jnp.float32),
                   jax.ShapeDtypeStruct((B, n_tri, 1, 1), jnp.float32)),
        grid_spec=pltpu.PrefetchScalarGridSpec(
            num_scalar_prefetch=2,
            grid=(B, n_tri),
            in_specs=[
                pl.BlockSpec((1, 2, T, K), lambda b, t, it, jt: (b, 0, it[t], 0)),
                pl.BlockSpec((1, 2, K, T), lambda b, t, it, jt: (b, 0, 0, jt[t])),
            ],
            out_specs=(pl.BlockSpec((1, 1, 1, 1), lambda b, t, it, jt: (b, t, 0, 0)),
                       pl.BlockSpec((1, 1, 1, 1), lambda b, t, it, jt: (b, t, 0, 0))),
        ),
        compiler_params=pltpu.CompilerParams(
            dimension_semantics=("parallel", "parallel"),
            vmem_limit_bytes=vmem_limit_bytes),
    )(i_tab, j_tab, lhs, rhs)
    return jnp.sum(sq), jnp.sum(cnt)


# ----------------------------------------------------------------------------
# logits2internal: cheap O(B*L) elementwise glue (acos/asin kept in plain JAX).
# ----------------------------------------------------------------------------
def logits2internal(output, internal, mask_str, eps):
    ba = output['ba_logits']
    da = output['da_logits']
    bl = output['bl_logits']

    def half_angle(c, s):
        n = jnp.sqrt(c * c + s * s) + eps
        return 0.5 * (jnp.arccos(c / n) + (jnp.pi - jnp.arcsin(s / n)))

    ba_C_N_CA = half_angle(ba[..., 0], ba[..., 1])
    ba_N_CA_C = half_angle(ba[..., 2], ba[..., 3])
    ba_CA_C_N = half_angle(ba[..., 4], ba[..., 5])
    da_CA_C_N_CA = half_angle(da[..., 0], da[..., 1])
    da_C_N_CA_C = half_angle(da[..., 2], da[..., 3])
    da_N_CA_C_N = half_angle(da[..., 4], da[..., 5])

    w = lambda a, b: jnp.where(mask_str, a, b)
    return {
        'bl_N_CA': w(bl[..., 0], internal['bl_N_CA']),
        'bl_CA_C': w(bl[..., 1], internal['bl_CA_C']),
        'bl_C_N': w(bl[..., 2], internal['bl_C_N']),
        'ba_C_N_CA': w(ba_C_N_CA, internal['ba_C_N_CA']),
        'ba_N_CA_C': w(ba_N_CA_C, internal['ba_N_CA_C']),
        'ba_CA_C_N': w(ba_CA_C_N, internal['ba_CA_C_N']),
        'da_CA_C_N_CA': w(da_CA_C_N_CA, internal['da_CA_C_N_CA']),
        'da_C_N_CA_C': w(da_C_N_CA_C, internal['da_C_N_CA_C']),
        'da_N_CA_C_N': w(da_N_CA_C_N, internal['da_N_CA_C_N']),
    }


# ----------------------------------------------------------------------------
# InternalToCRAB: sequential NeRF chain extension (inherently serial along the
# residue chain -> no clean Pallas equivalent; plain JAX lax.scan).
# TODO(synk): original InternalToCRAB source unavailable; a standard NeRF
#             reconstruction with an arbitrary canonical seed frame is used.
# ----------------------------------------------------------------------------
def _nerf(a, b, c, bl, ang, dih):
    bc = c - b
    bc = bc / (jnp.linalg.norm(bc) + 1e-8)
    ab = b - a
    n = jnp.cross(ab, bc)
    n = n / (jnp.linalg.norm(n) + 1e-8)
    m = jnp.cross(n, bc)
    d = jnp.stack([-jnp.cos(ang), jnp.sin(ang) * jnp.cos(dih),
                   jnp.sin(ang) * jnp.sin(dih)])
    return c + bl * (d[0] * bc + d[1] * m + d[2] * n)


def internal_to_crab(reb):
    def single(bl_n_ca, bl_ca_c, bl_c_n, ba_cnca, ba_ncac, ba_cacn,
               da_cacnca, da_cncac, da_ncacn):
        n0 = jnp.zeros(3, jnp.float32)
        ca0 = jnp.array([1.0, 0.0, 0.0], jnp.float32) * bl_n_ca[0]
        c0 = ca0 + bl_ca_c[0] * jnp.array(
            [-jnp.cos(ba_ncac[0]), jnp.sin(ba_ncac[0]), 0.0])

        def step(carry, xs):
            n_i, ca_i, c_i = carry
            (bl_cn_i, ba_cacn_i, da_ncacn_i,
             bl_nca_n, ba_cnca_n, da_cacnca_i,
             bl_cac_n, ba_ncac_n, da_cncac_i) = xs
            n_n = _nerf(n_i, ca_i, c_i, bl_cn_i, ba_cacn_i, da_ncacn_i)
            ca_n = _nerf(ca_i, c_i, n_n, bl_nca_n, ba_cnca_n, da_cacnca_i)
            c_n = _nerf(c_i, n_n, ca_n, bl_cac_n, ba_ncac_n, da_cncac_i)
            return (n_n, ca_n, c_n), jnp.stack([n_n, ca_n, c_n])

        xs = (bl_c_n[:-1], ba_cacn[:-1], da_ncacn[:-1],
              bl_n_ca[1:], ba_cnca[1:], da_cacnca[:-1],
              bl_ca_c[1:], ba_ncac[1:], da_cncac[:-1])
        _, rest = lax.scan(step, (n0, ca0, c0), xs)           # (L-1, 3, 3)
        first = jnp.stack([n0, ca0, c0])[None]                # (1, 3, 3)
        return jnp.concatenate([first, rest], axis=0)         # (L, 3, 3)

    return jax.vmap(single)(
        reb['bl_N_CA'], reb['bl_CA_C'], reb['bl_C_N'],
        reb['ba_C_N_CA'], reb['ba_N_CA_C'], reb['ba_CA_C_N'],
        reb['da_CA_C_N_CA'], reb['da_C_N_CA_C'], reb['da_N_CA_C_N'])


# ----------------------------------------------------------------------------
# Full forward pass.
# ----------------------------------------------------------------------------
def _prepare_coords(batched_data, eps):
    padding_mask = batched_data['crab']['padding_mask']            # (B, L) bool
    ca = batched_data['crab']['A'][:, :, 1, :].astype(jnp.float32)
    ca = jnp.where(padding_mask[..., None], 0.0, ca)               # masked_fill

    reb = logits2internal(batched_data['output'], batched_data['internal'],
                          batched_data['mask']['mask_str'], eps)
    A_reb = internal_to_crab(reb)                                  # (B, L, 3, 3)
    ca_reb = A_reb[:, :, 1, :].astype(jnp.float32)
    ca_reb = jnp.where(padding_mask[..., None], 0.0, ca_reb)
    return ca, ca_reb, padding_mask


def rebuilt_ca_distogram_loss(batched_data, eps=1e-6):
    ca, ca_reb, padding_mask = _prepare_coords(batched_data, eps)
    valid = (~padding_mask).astype(jnp.float32)
    # Note: the first F.mse_loss on raw coords in the PyTorch forward is dead
    # code (immediately overwritten), so only the distogram MSE is computed.
    sq, cnt = distogram_stats_pallas(ca, ca_reb, valid)
    # Deliberate divergence: guard cnt == 0 (all pairs masked/out of range);
    # torch would produce NaN there.
    disto_loss = jnp.where(cnt > 0, 0.5 * sq / jnp.maximum(cnt, 1.0), 0.0)
    return {'disto_loss': disto_loss}


def reference_loss(batched_data, eps=1e-6):
    ca, ca_reb, padding_mask = _prepare_coords(batched_data, eps)
    d = jnp.linalg.norm(ca[:, :, None, :] - ca[:, None, :, :], axis=-1)
    dr = jnp.linalg.norm(ca_reb[:, :, None, :] - ca_reb[:, None, :, :], axis=-1)
    padd = ~(padding_mask[:, :, None] | padding_mask[:, None, :])
    dmask = (d > DIST_MIN) & (d < DIST_MAX)
    m = (padd & dmask).astype(jnp.float32)
    err = d - dr
    return 0.5 * jnp.sum(err * err * m) / jnp.sum(m)


if __name__ == "__main__":
    B, L = 2, 16
    eps = 1e-6
    k = jax.random.split(jax.random.PRNGKey(0), 12)

    # Ground-truth CA coords as a random walk so pairwise dists fall in-bin.
    ca_gt = jnp.cumsum(jax.random.normal(k[0], (B, L, 3)) * 2.0, axis=1)
    A = jnp.stack([ca_gt + 0.5 * jax.random.normal(k[1], (B, L, 3)),
                   ca_gt,
                   ca_gt + 0.5 * jax.random.normal(k[2], (B, L, 3))], axis=2)

    lengths = jnp.array([L, L - 3])
    padding_mask = jnp.arange(L)[None, :] >= lengths[:, None]        # (B, L)
    mask_str = jax.random.bernoulli(k[3], 0.7, (B, L))               # (B, L)

    batched_data = {
        'crab': {'padding_mask': padding_mask, 'A': A},
        'mask': {'mask_str': mask_str},
        'output': {
            'ba_logits': jax.random.normal(k[4], (B, L, 6)),
            'da_logits': jax.random.normal(k[5], (B, L, 6)),
            'bl_logits': 1.2 + 0.4 * jax.random.uniform(k[6], (B, L, 3)),
        },
        'internal': {
            'bl_N_CA': 1.46 + 0.02 * jax.random.normal(k[7], (B, L)),
            'bl_CA_C': 1.52 + 0.02 * jax.random.normal(k[8], (B, L)),
            'bl_C_N': 1.33 + 0.02 * jax.random.normal(k[9], (B, L)),
            'ba_C_N_CA': 2.12 + 0.05 * jax.random.normal(k[10], (B, L)),
            'ba_N_CA_C': 1.94 + 0.05 * jax.random.normal(k[11], (B, L)),
            'ba_CA_C_N': jnp.full((B, L), 2.03),
            'da_CA_C_N_CA': jnp.full((B, L), 3.00),
            'da_C_N_CA_C': jnp.full((B, L), 1.20),
            'da_N_CA_C_N': jnp.full((B, L), 2.40),
        },
    }

    out = rebuilt_ca_distogram_loss(batched_data, eps=eps)
    loss = jax.block_until_ready(out['disto_loss'])

    ref = jax.block_until_ready(reference_loss(batched_data, eps=eps))
    assert jnp.isfinite(loss), f"non-finite loss: {loss}"
    assert jnp.allclose(loss, ref, rtol=2e-4, atol=2e-4), (loss, ref)
    print("KERNEL_OK")
</pallas_src>

<mosaic_0001>
module attributes {stable_mosaic.version = 11 : i64} {
  func.func @_disto_kernel(%arg0: i32, %arg1: i32, %arg2: memref<1xi32, #tpu.memory_space<smem>>, %arg3: memref<1xi32, #tpu.memory_space<smem>>, %arg4: memref<1x2x128x24xbf16, #tpu.memory_space<vmem>>, %arg5: memref<1x2x24x128xbf16, #tpu.memory_space<vmem>>, %arg6: memref<1x1x1x1xf32, #tpu.memory_space<vmem>>, %arg7: memref<1x1x1x1xf32, #tpu.memory_space<vmem>>) attributes {dimension_semantics = [#tpu.dimension_semantics<parallel>, #tpu.dimension_semantics<parallel>], iteration_bounds = array<i64: 2, 1>, scalar_prefetch = 2 : i64, scratch_operands = 0 : i64, tpu.core_type = #tpu.core_type<tc>, window_params = [{transform_indices = @transform_0, window_bounds = array<i64: 1, 2, 128, 24>}, {transform_indices = @transform_1, window_bounds = array<i64: 1, 2, 24, 128>}, {transform_indices = @transform_2, window_bounds = array<i64: 1, 1, 1, 1>}, {transform_indices = @transform_3, window_bounds = array<i64: 1, 1, 1, 1>}]} {
    %0 = arith.index_cast %arg1 : i32 to index
    %1 = memref.load %arg2[%0] : memref<1xi32, #tpu.memory_space<smem>>
    %2 = arith.index_cast %arg1 : i32 to index
    %3 = memref.load %arg3[%2] : memref<1xi32, #tpu.memory_space<smem>>
    %c0 = arith.constant 0 : index
    %c0_0 = arith.constant 0 : index
    %c0_1 = arith.constant 0 : index
    %c0_2 = arith.constant 0 : index
    %4 = vector.load %arg4[%c0, %c0_0, %c0_1, %c0_2] : memref<1x2x128x24xbf16, #tpu.memory_space<vmem>>, vector<1x1x128x24xbf16>
    %5 = vector.shape_cast %4 : vector<1x1x128x24xbf16> to vector<128x24xbf16>
    %c0_3 = arith.constant 0 : index
    %c0_4 = arith.constant 0 : index
    %c0_5 = arith.constant 0 : index
    %c0_6 = arith.constant 0 : index
    %6 = vector.load %arg5[%c0_3, %c0_4, %c0_5, %c0_6] : memref<1x2x24x128xbf16, #tpu.memory_space<vmem>>, vector<1x1x24x128xbf16>
    %7 = vector.shape_cast %6 : vector<1x1x24x128xbf16> to vector<24x128xbf16>
    %cst = arith.constant dense<0.000000e+00> : vector<128x128xf32>
    %8 = tpu.matmul %5, %7, %cst {dimension_numbers = #tpu.dot_dimension_numbers<[1], [0], [0], [1], [0, 0, 1, 1], [], []>} : vector<128x24xbf16>, vector<24x128xbf16>, vector<128x128xf32> -> vector<128x128xf32>
    %c0_7 = arith.constant 0 : index
    %c1 = arith.constant 1 : index
    %c0_8 = arith.constant 0 : index
    %c0_9 = arith.constant 0 : index
    %9 = vector.load %arg4[%c0_7, %c1, %c0_8, %c0_9] : memref<1x2x128x24xbf16, #tpu.memory_space<vmem>>, vector<1x1x128x24xbf16>
    %10 = vector.shape_cast %9 : vector<1x1x128x24xbf16> to vector<128x24xbf16>
    %c0_10 = arith.constant 0 : index
    %c1_11 = arith.constant 1 : index
    %c0_12 = arith.constant 0 : index
    %c0_13 = arith.constant 0 : index
    %11 = vector.load %arg5[%c0_10, %c1_11, %c0_12, %c0_13] : memref<1x2x24x128xbf16, #tpu.memory_space<vmem>>, vector<1x1x24x128xbf16>
    %12 = vector.shape_cast %11 : vector<1x1x24x128xbf16> to vector<24x128xbf16>
    %cst_14 = arith.constant dense<0.000000e+00> : vector<128x128xf32>
    %13 = tpu.matmul %10, %12, %cst_14 {dimension_numbers = #tpu.dot_dimension_numbers<[1], [0], [0], [1], [0, 0, 1, 1], [], []>} : vector<128x24xbf16>, vector<24x128xbf16>, vector<128x128xf32> -> vector<128x128xf32>
    %cst_15 = arith.constant 0.000000e+00 : f32
    %14 = vector.broadcast %cst_15 : f32 to vector<128x128xf32>
    %15 = arith.maximumf %8, %14 : vector<128x128xf32>
    %16 = math.sqrt %15 : vector<128x128xf32>
    %cst_16 = arith.constant 0.000000e+00 : f32
    %17 = vector.broadcast %cst_16 : f32 to vector<128x128xf32>
    %18 = arith.maximumf %13, %17 : vector<128x128xf32>
    %19 = math.sqrt %18 : vector<128x128xf32>
    %cst_17 = arith.constant 5.34765625 : f32
    %20 = vector.broadcast %cst_17 : f32 to vector<128x128xf32>
    %21 = arith.cmpf ogt, %8, %20 : vector<128x128xf32>
    %cst_18 = arith.constant 470.347656 : f32
    %22 = vector.broadcast %cst_18 : f32 to vector<128x128xf32>
    %23 = arith.cmpf olt, %8, %22 : vector<128x128xf32>
    %24 = arith.andi %21, %23 : vector<128x128xi1>
    %25 = arith.extui %24 : vector<128x128xi1> to vector<128x128xi32>
    %26 = arith.sitofp %25 : vector<128x128xi32> to vector<128x128xf32>
    %27 = arith.subf %16, %19 : vector<128x128xf32>
    %28 = arith.cmpi sgt, %3, %1 : i32
    %cst_19 = arith.constant 2.000000e+00 : f32
    %cst_20 = arith.constant 1.000000e+00 : f32
    %29 = arith.select %28, %cst_19, %cst_20 : f32
    %30 = arith.mulf %27, %27 : vector<128x128xf32>
    %31 = arith.mulf %26, %30 : vector<128x128xf32>
    %32 = vector.shape_cast %31 : vector<128x128xf32> to vector<1x128x128xf32>
    %cst_21 = arith.constant dense<0.000000e+00> : vector<1xf32>
    %33 = vector.multi_reduction <add>, %32, %cst_21 [1, 2] : vector<1x128x128xf32> to vector<1xf32>
    %34 = vector.shape_cast %33 : vector<1xf32> to vector<1x1x1xf32>
    %35 = vector.extract %34[0, 0, 0] : f32 from vector<1x1x1xf32>
    %36 = vector.broadcast %35 : f32 to vector<1x1xf32>
    %37 = vector.broadcast %29 : f32 to vector<1x1xf32>
    %38 = arith.mulf %37, %36 : vector<1x1xf32>
    %c0_22 = arith.constant 0 : index
    %c0_23 = arith.constant 0 : index
    %c0_24 = arith.constant 0 : index
    %c0_25 = arith.constant 0 : index
    %39 = vector.load %arg6[%c0_22, %c0_23, %c0_24, %c0_25] : memref<1x1x1x1xf32, #tpu.memory_space<vmem>>, vector<1x1x1x1xf32>
    %40 = vector.shape_cast %39 : vector<1x1x1x1xf32> to vector<1x1xf32>
    %41 = vector.shape_cast %38 : vector<1x1xf32> to vector<1x1x1x1xf32>
    tpu.vector_store %arg6[%c0_22, %c0_23, %c0_24, %c0_25], %41 {strides = array<i32>} : memref<1x1x1x1xf32, #tpu.memory_space<vmem>>, vector<1x1x1x1xf32>,
    %42 = vector.shape_cast %26 : vector<128x128xf32> to vector<1x128x128xf32>
    %cst_26 = arith.constant dense<0.000000e+00> : vector<1xf32>
    %43 = vector.multi_reduction <add>, %42, %cst_26 [1, 2] : vector<1x128x128xf32> to vector<1xf32>
    %44 = vector.shape_cast %43 : vector<1xf32> to vector<1x1x1xf32>
    %45 = vector.extract %44[0, 0, 0] : f32 from vector<1x1x1xf32>
    %46 = vector.broadcast %45 : f32 to vector<1x1xf32>
    %47 = vector.broadcast %29 : f32 to vector<1x1xf32>
    %48 = arith.mulf %47, %46 : vector<1x1xf32>
    %c0_27 = arith.constant 0 : index
    %c0_28 = arith.constant 0 : index
    %c0_29 = arith.constant 0 : index
    %c0_30 = arith.constant 0 : index
    %49 = vector.load %arg7[%c0_27, %c0_28, %c0_29, %c0_30] : memref<1x1x1x1xf32, #tpu.memory_space<vmem>>, vector<1x1x1x1xf32>
    %50 = vector.shape_cast %49 : vector<1x1x1x1xf32> to vector<1x1xf32>
    %51 = vector.shape_cast %48 : vector<1x1xf32> to vector<1x1x1x1xf32>
    tpu.vector_store %arg7[%c0_27, %c0_28, %c0_29, %c0_30], %51 {strides = array<i32>} : memref<1x1x1x1xf32, #tpu.memory_space<vmem>>, vector<1x1x1x1xf32>,
    return
  }
  func.func @transform_0(%arg0: i32, %arg1: i32, %arg2: memref<1xi32, #tpu.memory_space<smem>>, %arg3: memref<1xi32, #tpu.memory_space<smem>>) -> (i32, i32, i32, i32) {
    %0 = arith.index_cast %arg1 : i32 to index
    %1 = memref.load %arg2[%0] : memref<1xi32, #tpu.memory_space<smem>>
    %c0_i32 = arith.constant 0 : i32
    %c0_i32_0 = arith.constant 0 : i32
    %c0_i32_1 = arith.constant 0 : i32
    return %arg0, %c0_i32, %1, %c0_i32_0 : i32, i32, i32, i32
  }
  func.func @transform_1(%arg0: i32, %arg1: i32, %arg2: memref<1xi32, #tpu.memory_space<smem>>, %arg3: memref<1xi32, #tpu.memory_space<smem>>) -> (i32, i32, i32, i32) {
    %0 = arith.index_cast %arg1 : i32 to index
    %1 = memref.load %arg3[%0] : memref<1xi32, #tpu.memory_space<smem>>
    %c0_i32 = arith.constant 0 : i32
    %c0_i32_0 = arith.constant 0 : i32
    %c0_i32_1 = arith.constant 0 : i32
    return %arg0, %c0_i32, %c0_i32_0, %1 : i32, i32, i32, i32
  }
  func.func @transform_2(%arg0: i32, %arg1: i32, %arg2: memref<1xi32, #tpu.memory_space<smem>>, %arg3: memref<1xi32, #tpu.memory_space<smem>>) -> (i32, i32, i32, i32) {
    %c0_i32 = arith.constant 0 : i32
    %c0_i32_0 = arith.constant 0 : i32
    %c0_i32_1 = arith.constant 0 : i32
    return %arg0, %arg1, %c0_i32, %c0_i32_0 : i32, i32, i32, i32
  }
  func.func @transform_3(%arg0: i32, %arg1: i32, %arg2: memref<1xi32, #tpu.memory_space<smem>>, %arg3: memref<1xi32, #tpu.memory_space<smem>>) -> (i32, i32, i32, i32) {
    %c0_i32 = arith.constant 0 : i32
    %c0_i32_0 = arith.constant 0 : i32
    %c0_i32_1 = arith.constant 0 : i32
    return %arg0, %arg1, %c0_i32, %c0_i32_0 : i32, i32, i32, i32
  }
}

</mosaic_0001>

<bundles_post_ra>
// kernel: tpu_custom_call.1
= control target key start
LH: loop header
LB: loop body
LE: loop exit
PB: predicated region body
PF: predicated region fallthrough
CT: control target
= control target key end

     0   :  { %s1545_s22 = smov 0   ;;  %s1547_s23 = smov 0   ;;  %s2227_s0 = inlined_call_operand.<no memory space> [shape: s32[1], index: 0, kind: input, shape index: {}]   ;;  %s2228_s1 = inlined_call_operand.<no memory space> [shape: s32[1], index: 1, kind: input, shape index: {}]   ;;  %s2229_s2 = inlined_call_operand.vmem [shape: bf16[2,2,128,24], index: 2, kind: input, shape index: {}]   ;;  %s2230_s3 = inlined_call_operand.vmem [shape: bf16[2,2,24,128], index: 3, kind: input, shape index: {}]   ;;  %s2231_s4 = inlined_call_operand.vmem [shape: f32[2,1,1,1], index: 4, kind: output, shape index: {0}]   ;;  %s2232_s5 = inlined_call_operand.vmem [shape: f32[2,1,1,1], index: 5, kind: output, shape index: {1}]  }
   0x1   :  { %11 = sst [smem:[#allocation3]] %s2227_s0  ;;  %s1549_s24 = smov 0  }
   0x2   :  { %12 = sst [smem:[#allocation4]] %s2228_s1 }
   0x3 LB: > { %s30_s0 = sadd.s32 1, %s1502_s23  ;;  %p1230_p0 = scmp.ge.s32.totalorder %s1506_s24, 1  ;;  %s1506_s24 = sphi %s1549_s24, %s18_s24   ;;  %s1502_s23 = sphi %s1547_s23, %s2244_s23   ;;  %s1498_s22 = sphi %s1545_s22, %s2243_s22  }
   0x4   : > { %p32_p1 = scmp.ge.s32.totalorder %s30_s0, 2  ;;  %p190_p2 = scmp.lt.s32.totalorder %s1506_s24, 3 }
   0x6   : > { %s2246_s0 = smov (%p32_p1, %s30_s0), 0  ;;  %p191_p3 = pnand %p1230_p0, %p190_p2 }
   0x7   : > { %s235_s1 = sld [smem:[#allocation3]] (!%p191_p3)  ;;  %p237_p4 = scmp.lt.s32.totalorder (!%p191_p3), %s1498_s22, 1 }
   0x8   : > { %194 = sbr.rel (%p191_p3) target bundleno = 534 (0x216), region = 28  ;;  %s247_s25 = sld [smem:[#allocation4]] (!%p191_p3) }
   0x9   : > { %s270_s14 = sld [smem:[#allocation3]] (!%p191_p3) }
   0xa   : > { %s271_s15 = sld [smem:[#allocation4]] (!%p191_p3) }
   0xd   : > { %s2248_s22 = smov (!%p237_p4, %s1498_s22), 1  ;;  %s1231_s26 = sshll.u32 %s235_s1, 4  ;;  %vm340_vm0 = vcmask 195584   ;;  %vm365_vm1 = vcmask 1043456   ;;  %v1508_v49 = vmov 0.0  }
   0xe   : > { %p239_p5 = scmp.lt.s32.totalorder %s1231_s26, 15  ;;  %p250_p6 = scmp.lt.s32.totalorder %s247_s25, 0 }
   0xf   : > { %s1232_s27 = sshll.u32 %s2248_s22, 5  ;;  %s1370_s28 = smul.u32 6, %s2248_s22 }
  0x10   : > { %s2250_s26 = smov (!%p239_p5, %s1231_s26), 15  ;;  %s2252_s25 = smov (!%p250_p6, %s247_s25), 0 }
  0x11   : > { %s242_s29 = sadd.s32 %s1232_s27, %s2250_s26  ;;  %s253_s6 = sadd.s32 %s1370_s28, %s2252_s25 }
  0x12   : > { %s1233_s30 = sshll.u32 %s242_s29, 2  ;;  %s1234_s10 = sshll.u32 %s253_s6, 2 }
  0x13   : > { %s1570_s9 = scalar_lea.vmem %s2229_s2, %s1233_s30  ;;  %s255_s13 = scalar_lea.vmem %s2230_s3, %s1234_s10 }
  0x14   : > { %v1404_v0 = vld [vmem:[%s1570_s9] sm:$0xff]   ;;  %v1400_v1 = vld [vmem:[%s255_s13 + $0x8] ss:$0 sps:$4 sm:$0xff]   ;;  %v1401_v2 = vld [vmem:[%s255_s13 + $0x14] ss:$0 sps:$4 sm:$0xff]   ;;  %p1012_p7 = scmp.gt.s32.totalorder %s271_s15, %s270_s14  ;;  %s262_s20 = scalar_lea.vmem %s2231_s4, %s2248_s22 }
  0x15   : > { %1332 = vmatprep.mubr.msk.bf16.mxu0 %vm340_vm0, %v1404_v0  ;;  %1368 = vmatprep.subr.msk.bf16.mxu0 %vm365_vm1, %v1400_v1  ;;  %v367_v3 = vsel %vm365_vm1, %v1400_v1, 0  ;;  %v1402_v4 = vld [vmem:[%s255_s13] sm:$0xff]   ;;  %v561_v5 = vsel %vm365_vm1, %v1401_v2, 0  ;;  %v1403_v6 = vld [vmem:[%s255_s13 + $0xc] sm:$0xff]   ;;  %v1410_v12 = vld [vmem:[%s1570_s9 + $0x18] sm:$0xff]   ;;  %s268_s26 = scalar_lea.vmem %s2232_s5, %s2248_s22 }
  0x16   : > { %1369 = vmatprep.subr.msk.bf16.mxu1 %vm365_vm1, %v1401_v2  ;;  %1329 = vmatpush3.bf16.msra.mxu0 %v367_v3  ;;  %v1405_v7 = vld [vmem:[%s1570_s9 + $0x40] sm:$0xff]   ;;  %v1406_v8 = vld [vmem:[%s1570_s9 + $0x8] sm:$0xff]   ;;  %v1408_v10 = vld [vmem:[%s1570_s9 + $0x10] sm:$0xff]   ;;  %s1013_s16 = scalar_select %p1012_p7, 2.0, 1.0 }
  0x17   : > { %1349 = vmatpush3.bf16.msra.mxu1 %v561_v5  ;;  %1330 = vmatprep.subr.bf16.mxu0 %v1402_v4  ;;  %v1407_v9 = vld [vmem:[%s1570_s9 + $0x48] sm:$0xff]   ;;  %v1409_v11 = vld [vmem:[%s1570_s9 + $0x50] sm:$0xff]   ;;  %v1411_v13 = vld [vmem:[%s1570_s9 + $0x58] sm:$0xff]  }
  0x18   : > { %1350 = vmatprep.subr.bf16.mxu1 %v1403_v6  ;;  %1352 = vmatprep.mubr.msk.bf16.mxu1 %vm340_vm0, %v1405_v7  ;;  %v1412_v14 = vld [vmem:[%s1570_s9 + $0x20] sm:$0xff]   ;;  %v1414_v16 = vld [vmem:[%s1570_s9 + $0x28] sm:$0xff]   ;;  %v1416_v18 = vld [vmem:[%s1570_s9 + $0x30] sm:$0xff]  }
  0x19   : > { %v1413_v15 = vld [vmem:[%s1570_s9 + $0x60] sm:$0xff]   ;;  %v1415_v17 = vld [vmem:[%s1570_s9 + $0x68] sm:$0xff]   ;;  %v1417_v19 = vld [vmem:[%s1570_s9 + $0x70] sm:$0xff]  }
  0x1a   : > { %1331 = vmatpush3.bf16.msra.mxu0 %v1402_v4  ;;  %v1418_v20 = vld [vmem:[%s1570_s9 + $0x38] sm:$0xff]  }
  0x1b   : > { %1351 = vmatpush3.bf16.msra.mxu1 %v1403_v6  ;;  %v1419_v21 = vld [vmem:[%s1570_s9 + $0x78] sm:$0xff]  }
  0x1d   : > { %1333 = vmatmul.mubr.msk.bf16.vlgmr.msra.gmra.mxu0 %vm340_vm0, %v1406_v8 }
  0x1e   : > { %1353 = vmatmul.mubr.msk.bf16.vlgmr.msra.gmra.mxu1 %vm340_vm0, %v1407_v9  ;;  %1336 = vmatprep.mubr.msk.bf16.mxu0 %vm340_vm0, %v1408_v10 }
  0x1f   : > { %1356 = vmatprep.mubr.msk.bf16.mxu1 %vm340_vm0, %v1409_v11 }
  0x25   : > { %1337 = vmatmul.mubr.msk.bf16.gmra.mxu0 %vm340_vm0, %v1410_v12 }
  0x26   : > { %1357 = vmatmul.mubr.msk.bf16.gmra.mxu1 %vm340_vm0, %v1411_v13  ;;  %1340 = vmatprep.mubr.msk.bf16.mxu0 %vm340_vm0, %v1412_v14 }
  0x27   : > { %1360 = vmatprep.mubr.msk.bf16.mxu1 %vm340_vm0, %v1413_v15 }
  0x2d   : > { %1341 = vmatmul.mubr.msk.bf16.gmra.mxu0 %vm340_vm0, %v1414_v16 }
  0x2e   : > { %1361 = vmatmul.mubr.msk.bf16.gmra.mxu1 %vm340_vm0, %v1415_v17  ;;  %1344 = vmatprep.mubr.msk.bf16.mxu0 %vm340_vm0, %v1416_v18 }
  0x2f   : > { %1364 = vmatprep.mubr.msk.bf16.mxu1 %vm340_vm0, %v1417_v19 }
  0x35   : > { %1345 = vmatmul.mubr.msk.bf16.gmra.mxu0 %vm340_vm0, %v1418_v20 }
  0x36   : > { %1365 = vmatmul.mubr.msk.bf16.gmra.mxu1 %vm340_vm0, %v1419_v21 }
  0xdd   : > { %v1334_v22 = vpop.f32.mrf.mxu0 }
  0xde   : > { %v1354_v23 = vpop.f32.mrf.mxu1  ;;  %v1607_v27 = vmax.f32 %v1334_v22, 0.0  ;;  %vm918_vm2 = vcmp.gt.f32.partialorder %v1334_v22, 5.3476563  ;;  %vm934_vm3 = vcmp.lt.f32.partialorder %v1334_v22, 470.34766 }
  0xdf   : > { %v403_v24 = vpop.f32.mrf.mxu0  ;;  %v1609_v29 = vmax.f32 %v1354_v23, 0.0  ;;  %vm1635_vm4 = vmand %vm918_vm2, %vm934_vm3 }
  0xe0   : > { %v597_v25 = vpop.f32.mrf.mxu1  ;;  %v1611_v30 = vmax.f32 %v403_v24, 0.0  ;;  %1420 = vrsqrt.f32 %v1607_v27  ;;  %vm916_vm5 = vcmp.gt.f32.partialorder %v403_v24, 5.3476563  ;;  %vm932_vm6 = vcmp.lt.f32.partialorder %v403_v24, 470.34766 }
  0xe1   : > { %v1335_v26 = vpop.f32.mrf.mxu0  ;;  %v1614_v32 = vmax.f32 %v597_v25, 0.0  ;;  %1422 = vrsqrt.f32 %v1609_v29  ;;  %vm692_vm9 = vcmp.eq.f32.partialorder %v1607_v27, inf  ;;  %vm694_vm12 = vcmp.eq.f32.partialorder %v1607_v27, 0.0  ;;  %vm1657_vm14 = vmand %vm916_vm5, %vm932_vm6 }
  0xe2   : > { %v1355_v28 = vpop.f32.mrf.mxu1  ;;  %v1617_v34 = vmax.f32 %v1335_v26, 0.0  ;;  %1424 = vrsqrt.f32 %v1611_v30  ;;  %vm919_vm10 = vcmp.gt.f32.partialorder %v1335_v26, 5.3476563  ;;  %vm935_vm11 = vcmp.lt.f32.partialorder %v1335_v26, 470.34766 }
  0xe3   : > { %v406_v31 = vpop.f32.mrf.mxu0  ;;  %1426 = vrsqrt.f32 %v1614_v32  ;;  %v1625_v37 = vmax.f32 %v1355_v28, 0.0  ;;  %v695_v48 = vand.u32 2147483648, %v1607_v27  ;;  %v1652_v50 = vsel %vm1635_vm4, 1.0, %v1508_v49  ;;  %vm1680_vm2 = vmand %vm919_vm10, %vm935_vm11 }
  0xe4   : > { %v600_v33 = vpop.f32.mrf.mxu1  ;;  %v1619_v35 = vmax.f32 %v406_v31, 0.0  ;;  %1428 = vrsqrt.f32 %v1617_v34  ;;  %vm917_vm7 = vcmp.gt.f32.partialorder %v406_v31, 5.3476563  ;;  %vm933_vm8 = vcmp.lt.f32.partialorder %v406_v31, 470.34766 }
  0xe5   : > { %v1622_v36 = vmax.f32 %v600_v33, 0.0  ;;  %v1629_v38 = vpop.f32.mrf.mxu0  ;;  %vm820_vm13 = vcmp.eq.f32.partialorder %v1609_v29, inf  ;;  %vm822_vm15 = vcmp.eq.f32.partialorder %v1609_v29, 0.0  ;;  %vm1667_vm0 = vmand %vm917_vm7, %vm933_vm8  ;;  %v823_v59 = vand.u32 2147483648, %v1609_v29 }
  0xe6   : > { %1430 = vrsqrt.f32 %v1619_v35  ;;  %v1358_v39 = vpop.f32.mrf.mxu1  ;;  %v1640_v43 = vmax.f32 %v1629_v38, 0.0  ;;  %vm678_vm1 = vcmp.eq.f32.partialorder %v1611_v30, inf  ;;  %vm680_vm3 = vcmp.eq.f32.partialorder %v1611_v30, 0.0 }
  0xe7   : > { %1432 = vrsqrt.f32 %v1622_v36  ;;  %v1633_v40 = vpop.f32.mrf.mxu0  ;;  %v1642_v45 = vmax.f32 %v1358_v39, 0.0  ;;  %v681_v62 = vand.u32 2147483648, %v1611_v30  ;;  %v1690_v63 = vsel %vm1657_vm14, 1.0, %v1508_v49 }
  0xe8   : > { %1434 = vrsqrt.f32 %v1625_v37  ;;  %v613_v41 = vpop.f32.mrf.mxu1  ;;  %v1673_v56 = vmax.f32 %v1633_v40, 0.0  ;;  %vm806_vm4 = vcmp.eq.f32.partialorder %v1614_v32, inf  ;;  %v809_v0 = vand.u32 2147483648, %v1614_v32 }
  0xe9   : > { %v1645_v47 = vpop.f32.mrf.mxu0  ;;  %1436 = vrsqrt.f32 %v1640_v43  ;;  %vm808_vm5 = vcmp.eq.f32.partialorder %v1614_v32, 0.0  ;;  %vm699_vm6 = vcmp.eq.f32.partialorder %v1617_v34, inf  ;;  %v702_v3 = vand.u32 2147483648, %v1617_v34 }
  0xea   : > { %v1661_v52 = vpop.f32.mrf.mxu1  ;;  %1438 = vrsqrt.f32 %v1642_v45  ;;  %v1702_v4 = vsel %vm1667_vm0, 1.0, %v1508_v49  ;;  %v1704_v5 = vmax.f32 %v613_v41, 0.0  ;;  %v1713_v10 = vsel %vm1680_vm2, 1.0, %v1508_v49 }
  0xeb   : > { %v1694_v1 = vpop.f32.mrf.mxu0  ;;  %1440 = vrsqrt.f32 %v1673_v56  ;;  %vm827_vm7 = vcmp.eq.f32.partialorder %v1625_v37, inf  ;;  %v830_v14 = vand.u32 2147483648, %v1625_v37  ;;  %vm701_vm8 = vcmp.eq.f32.partialorder %v1617_v34, 0.0 }
  0xec   : > { %v616_v6 = vpop.f32.mrf.mxu1  ;;  %vm685_vm10 = vcmp.eq.f32.partialorder %v1619_v35, inf  ;;  %v1075_v15 = vadd.f32 %v1702_v4, %v1690_v63  ;;  %vm922_vm11 = vcmp.gt.f32.partialorder %v1629_v38, 5.3476563  ;;  %vm938_vm14 = vcmp.lt.f32.partialorder %v1629_v38, 470.34766 }
  0xed   : > { %v1421_v44 = vpop.eup %1420  ;;  %v1729_v16 = vpop.f32.mrf.mxu0  ;;  %1442 = vrsqrt.f32 %v1704_v5  ;;  %v688_v26 = vand.u32 2147483648, %v1619_v35  ;;  %v816_v28 = vand.u32 2147483648, %v1622_v36  ;;  %vm954_vm0 = vmand %vm922_vm11, %vm938_vm14  ;;  %vm920_vm2 = vcmp.gt.f32.partialorder %v1633_v40, 5.3476563 }
  0xee   : > { %v1423_v46 = vpop.eup %1422  ;;  %v691_v54 = vmul.f32 %v1421_v44, %v1607_v27  ;;  %v1736_v20 = vpop.f32.mrf.mxu1  ;;  %vm937_vm11 = vcmp.lt.f32.partialorder %v1694_v1, 470.34766  ;;  %vm923_vm14 = vcmp.gt.f32.partialorder %v1645_v47, 5.3476563 }
  0xef   : > { %v1425_v53 = vpop.eup %1424  ;;  %v819_v58 = vmul.f32 %v1423_v46, %v1609_v29  ;;  %v1759_v31 = vpop.f32.mrf.mxu0 }
  0xf0   : > { %v1427_v57 = vpop.eup %1426  ;;  %v693_v8 = vsel %vm692_vm9, %v1607_v27, %v691_v54  ;;  %v677_v9 = vmul.f32 %v1425_v53, %v1611_v30  ;;  %vm829_vm9 = vcmp.eq.f32.partialorder %v1625_v37, 0.0  ;;  %v1076_v27 = vadd.f32 %v1652_v50, %v1075_v15  ;;  %v1767_v44 = vpop.f32.mrf.mxu1 }
  0xf1   : > { %v1429_v61 = vpop.eup %1428  ;;  %v821_v12 = vsel %vm820_vm13, %v1609_v29, %v819_v58  ;;  %v805_v13 = vmul.f32 %v1427_v57, %v1614_v32  ;;  %v696_v17 = vsel %vm694_vm12, %v695_v48, %v693_v8  ;;  %vm687_vm12 = vcmp.eq.f32.partialorder %v1619_v35, 0.0 }
  0xf2   : > { %v824_v21 = vsel %vm822_vm15, %v823_v59, %v821_v12  ;;  %v679_v22 = vsel %vm678_vm1, %v1611_v30, %v677_v9  ;;  %v698_v23 = vmul.f32 %v1429_v61, %v1617_v34  ;;  %vm813_vm13 = vcmp.eq.f32.partialorder %v1622_v36, inf  ;;  %v1796_v59 = vpop.f32.mrf.mxu0 }
  0xf3   : > { %v1431_v2 = vpop.eup %1430  ;;  %v807_v25 = vsel %vm806_vm4, %v1614_v32, %v805_v13  ;;  %vm815_vm15 = vcmp.eq.f32.partialorder %v1622_v36, 0.0  ;;  %v723_v29 = vand.u32 2147483648, %v1640_v43  ;;  %v998_v33 = vsub.f32 %v696_v17, %v824_v21 }
  0xf4   : > { %v1433_v7 = vpop.eup %1432  ;;  %v684_v18 = vmul.f32 %v1431_v2, %v1619_v35  ;;  %v682_v39 = vsel %vm680_vm3, %v681_v62, %v679_v22  ;;  %v810_v46 = vsel %vm808_vm5, %v809_v0, %v807_v25  ;;  %v700_v38 = vsel %vm699_vm6, %v1617_v34, %v698_v23  ;;  %v1825_v9 = vpop.f32.mrf.mxu0 }
  0xf5   : > { %v1435_v11 = vpop.eup %1434  ;;  %v812_v19 = vmul.f32 %v1433_v7, %v1622_v36  ;;  %vm720_vm1 = vcmp.eq.f32.partialorder %v1640_v43, inf  ;;  %v1779_v48 = vmax.f32 %v1645_v47, 0.0  ;;  %v1782_v53 = vsel %vm954_vm0, 1.0, %v1508_v49 }
  0xf6   : > { %v826_v24 = vmul.f32 %v1435_v11, %v1625_v37  ;;  %v686_v41 = vsel %vm685_vm10, %v1619_v35, %v684_v18  ;;  %v1437_v51 = vpop.eup %1436  ;;  %vm936_vm3 = vcmp.lt.f32.partialorder %v1633_v40, 470.34766  ;;  %v1787_v32 = vmax.f32 %v1694_v1, 0.0  ;;  %v1852_v23 = vpop.f32.mrf.mxu0 }
  0xf7   : > { %v814_v42 = vsel %vm813_vm13, %v1622_v36, %v812_v19  ;;  %v1439_v54 = vpop.eup %1438  ;;  %v689_v55 = vsel %vm687_vm12, %v688_v26, %v686_v41  ;;  %vm848_vm4 = vcmp.eq.f32.partialorder %v1642_v45, inf  ;;  %v1794_v58 = vmax.f32 %v616_v6, 0.0  ;;  %v1807_v36 = vpop.f32.mrf.mxu1  ;;  %vm952_vm10 = vmand %vm920_vm2, %vm936_vm3 }
  0xf8   : > { %v828_v30 = vsel %vm827_vm7, %v1625_v37, %v826_v24  ;;  %v817_v57 = vsel %vm815_vm15, %v816_v28, %v814_v42  ;;  %v996_v60 = vsub.f32 %v682_v39, %v810_v46  ;;  %v703_v61 = vsel %vm701_vm8, %v702_v3, %v700_v38  ;;  %v1441_v37 = vpop.eup %1440 }
  0xf9   : > { %v831_v62 = vsel %vm829_vm9, %v830_v14, %v828_v30  ;;  %vm722_vm5 = vcmp.eq.f32.partialorder %v1640_v43, 0.0  ;;  %vm850_vm6 = vcmp.eq.f32.partialorder %v1642_v45, 0.0  ;;  %v851_v35 = vand.u32 2147483648, %v1642_v45  ;;  %v632_v13 = vpop.f32.mrf.mxu1 }
  0xfa   : > { %v1016_v0 = vmul.f32 %v998_v33, %v998_v33  ;;  %vm706_vm7 = vcmp.eq.f32.partialorder %v1673_v56, inf  ;;  %v1077_v34 = vadd.f32 %v1713_v10, %v1076_v27  ;;  %1444 = vrsqrt.f32 %v1779_v48  ;;  %v1443_v14 = vpop.eup %1442 }
  0xfb   : > { %v997_v2 = vsub.f32 %v689_v55, %v817_v57  ;;  %v719_v3 = vmul.f32 %v1437_v51, %v1640_v43  ;;  %v847_v6 = vmul.f32 %v1439_v54, %v1642_v45  ;;  %1446 = vrsqrt.f32 %v1787_v32 }
  0xfc   : > { %v999_v7 = vsub.f32 %v703_v61, %v831_v62  ;;  %vm708_vm8 = vcmp.eq.f32.partialorder %v1673_v56, 0.0  ;;  %v709_v8 = vand.u32 2147483648, %v1673_v56  ;;  %v1822_v40 = vmax.f32 %v1661_v52, 0.0 }
  0xfd   : > { %1448 = vrsqrt.f32 %v1794_v58  ;;  %v1014_v11 = vmul.f32 %v996_v60, %v996_v60  ;;  %v1828_v12 = vsel %vm952_vm10, 1.0, %v1508_v49  ;;  %vm921_vm9 = vcmp.gt.f32.partialorder %v1694_v1, 5.3476563  ;;  %v1862_v1 = vpop.f32.mrf.mxu1 }
  0xfe   : > { %v705_v15 = vmul.f32 %v1441_v37, %v1673_v56  ;;  %v1078_v17 = vadd.f32 %v1828_v12, %v1077_v34  ;;  %vm939_vm12 = vcmp.lt.f32.partialorder %v1645_v47, 470.34766  ;;  %v1837_v52 = vmul.f32 %v1652_v50, %v1016_v0  ;;  %vm953_vm15 = vmand %vm921_vm9, %vm937_vm11 }
  0xff   : > { %v1015_v18 = vmul.f32 %v997_v2, %v997_v2  ;;  %v721_v19 = vsel %vm720_vm1, %v1640_v43, %v719_v3  ;;  %v849_v21 = vsel %vm848_vm4, %v1642_v45, %v847_v6  ;;  %v1017_v22 = vmul.f32 %v999_v7, %v999_v7  ;;  %vm955_vm1 = vmand %vm923_vm14, %vm939_vm12  ;;  %v645_v51 = vpop.f32.mrf.mxu1 }
 0x100   : > { %vm834_vm13 = vcmp.eq.f32.partialorder %v1704_v5, inf  ;;  %1450 = vrsqrt.f32 %v1822_v40  ;;  %v1850_v50 = vmax.f32 %v1759_v31, 0.0  ;;  %v1030_v24 = vmul.f32 %v1690_v63, %v1014_v11 }
 0x101   : > { %v833_v25 = vmul.f32 %v1443_v14, %v1704_v5  ;;  %vm836_vm0 = vcmp.eq.f32.partialorder %v1704_v5, 0.0  ;;  %v837_v26 = vand.u32 2147483648, %v1704_v5  ;;  %v724_v27 = vsel %vm722_vm5, %v723_v29, %v721_v19 }
 0x102   : > { %v852_v63 = vsel %vm850_vm6, %v851_v35, %v849_v21  ;;  %v707_v28 = vsel %vm706_vm7, %v1673_v56, %v705_v15  ;;  %v1874_v33 = vmax.f32 %v1729_v16, 0.0  ;;  %v1031_v47 = vmul.f32 %v1702_v4, %v1015_v18  ;;  %v1894_v4 = vpop.f32.mrf.mxu0 }
 0x103   : > { %v730_v39 = vand.u32 2147483648, %v1779_v48  ;;  %v1879_v41 = vsel %vm953_vm15, 1.0, %v1508_v49  ;;  %v1882_v43 = vmax.f32 %v1825_v9, 0.0  ;;  %v1885_v45 = vmul.f32 %v1713_v10, %v1017_v22 }
 0x104   : > { %v1888_v29 = vsel %vm955_vm1, 1.0, %v1508_v49  ;;  %1452 = vrsqrt.f32 %v1850_v50  ;;  %v1892_v42 = vmax.f32 %v1767_v44, 0.0  ;;  %v1896_v46 = vsub.f32 %v724_v27, %v852_v63  ;;  %v1926_v0 = vpop.f32.mrf.mxu0 }
 0x105   : > { %v710_v38 = vsel %vm708_vm8, %v709_v8, %v707_v28  ;;  %v835_v10 = vsel %vm834_vm13, %v1704_v5, %v833_v25  ;;  %v1904_v30 = vmax.f32 %v1736_v20, 0.0  ;;  %vm727_vm2 = vcmp.eq.f32.partialorder %v1779_v48, inf  ;;  %v1934_v5 = vpop.f32.mrf.mxu1 }
 0x106   : > { %v858_v44 = vand.u32 2147483648, %v1822_v40  ;;  %v1079_v54 = vadd.f32 %v1879_v41, %v1078_v17  ;;  %1454 = vrsqrt.f32 %v1874_v33  ;;  %v1911_v55 = vmax.f32 %v1796_v59, 0.0 }
 0x107   : > { %v1445_v56 = vpop.eup %1444  ;;  %v1913_v57 = vadd.f32 %v1031_v47, %v1030_v24  ;;  %vm713_vm3 = vcmp.eq.f32.partialorder %v1787_v32, inf  ;;  %v1917_v20 = vmax.f32 %v1807_v36, 0.0  ;;  %1456 = vrsqrt.f32 %v1882_v43  ;;  %v648_v15 = vpop.f32.mrf.mxu1 }
 0x108   : > { %v1447_v60 = vpop.eup %1446  ;;  %v838_v61 = vsel %vm836_vm0, %v837_v26, %v835_v10  ;;  %v716_v62 = vand.u32 2147483648, %v1787_v32  ;;  %1458 = vrsqrt.f32 %v1892_v42  ;;  %v1924_v35 = vmax.f32 %v632_v13, 0.0  ;;  %v1959_v13 = vpop.f32.mrf.mxu0 }
 0x109   : > { %vm926_vm4 = vcmp.gt.f32.partialorder %v1729_v16, 5.3476563  ;;  %vm942_vm5 = vcmp.lt.f32.partialorder %v1729_v16, 470.34766  ;;  %1460 = vrsqrt.f32 %v1904_v30  ;;  %v1932_v36 = vmax.f32 %v1894_v4, 0.0 }
 0x10a   : > { %v1449_v34 = vpop.eup %1448  ;;  %v726_v37 = vmul.f32 %v1445_v56, %v1779_v48  ;;  %vm715_vm6 = vcmp.eq.f32.partialorder %v1787_v32, 0.0  ;;  %v1080_v2 = vadd.f32 %v1782_v53, %v1079_v54  ;;  %1462 = vrsqrt.f32 %v1911_v55  ;;  %vm1954_vm11 = vmand %vm926_vm4, %vm942_vm5 }
 0x10b   : > { %v1941_v3 = vmax.f32 %v1852_v23, 0.0  ;;  %v1000_v6 = vsub.f32 %v710_v38, %v838_v61  ;;  %vm855_vm7 = vcmp.eq.f32.partialorder %v1822_v40, inf  ;;  %vm924_vm10 = vcmp.gt.f32.partialorder %v1759_v31, 5.3476563 }
 0x10c   : > { %vm940_vm8 = vcmp.lt.f32.partialorder %v1759_v31, 470.34766  ;;  %1464 = vrsqrt.f32 %v1917_v20  ;;  %v712_v7 = vmul.f32 %v1447_v60, %v1787_v32  ;;  %v840_v8 = vmul.f32 %v1449_v34, %v1794_v58 }
 0x10d   : > { %vm841_vm9 = vcmp.eq.f32.partialorder %v1794_v58, inf  ;;  %1466 = vrsqrt.f32 %v1924_v35  ;;  %v1451_v14 = vpop.eup %1450  ;;  %vm843_vm14 = vcmp.eq.f32.partialorder %v1794_v58, 0.0  ;;  %vm925_vm12 = vcmp.gt.f32.partialorder %v1825_v9, 5.3476563  ;;  %vm956_vm0 = vmand %vm924_vm10, %vm940_vm8 }
 0x10e   : > { %vm941_vm13 = vcmp.lt.f32.partialorder %v1825_v9, 470.34766  ;;  %1468 = vrsqrt.f32 %v1932_v36  ;;  %vm857_vm15 = vcmp.eq.f32.partialorder %v1822_v40, 0.0  ;;  %v844_v16 = vand.u32 2147483648, %v1794_v58 }
 0x10f   : > { %v1081_v17 = vadd.f32 %v1888_v29, %v1080_v2  ;;  %1470 = vrsqrt.f32 %v1941_v3  ;;  %v1973_v18 = vmax.f32 %v645_v51, 0.0  ;;  %v1975_v19 = vmul.f32 %v1000_v6, %v1000_v6  ;;  %vm957_vm1 = vmand %vm925_vm12, %vm941_vm13 }
 0x110   : > { %v728_v21 = vsel %vm727_vm2, %v1779_v48, %v726_v37  ;;  %v1983_v22 = vsel %vm1954_vm11, 1.0, %v1508_v49  ;;  %v1986_v31 = vmax.f32 %v1959_v13, 0.0  ;;  %v854_v24 = vmul.f32 %v1451_v14, %v1822_v40 }
 0x111   : > { %v714_v25 = vsel %vm713_vm3, %v1787_v32, %v712_v7  ;;  %v842_v26 = vsel %vm841_vm9, %v1794_v58, %v840_v8  ;;  %v1999_v27 = vmax.f32 %v648_v15, 0.0  ;;  %v1453_v63 = vpop.eup %1452  ;;  %vm729_vm2 = vcmp.eq.f32.partialorder %v1779_v48, 0.0 }
 0x112   : > { %v2003_v28 = vsel %vm956_vm0, 1.0, %v1508_v49  ;;  %vm927_vm4 = vcmp.gt.f32.partialorder %v1796_v59, 5.3476563  ;;  %vm943_vm3 = vcmp.lt.f32.partialorder %v1796_v59, 470.34766  ;;  %v2008_v47 = vmax.f32 %v1926_v0, 0.0 }
 0x113   : > { %v879_v38 = vand.u32 2147483648, %v1904_v30  ;;  %vm734_vm5 = vcmp.eq.f32.partialorder %v1850_v50, inf  ;;  %v1082_v9 = vadd.f32 %v2003_v28, %v1081_v17  ;;  %1472 = vrsqrt.f32 %v1973_v18  ;;  %v1455_v10 = vpop.eup %1454  ;;  %vm959_vm10 = vmand %vm927_vm4, %vm943_vm3 }
 0x114   : > { %v717_v51 = vsel %vm715_vm6, %v716_v62, %v714_v25  ;;  %v845_v54 = vsel %vm843_vm14, %v844_v16, %v842_v26  ;;  %v2019_v56 = vsel %vm957_vm1, 1.0, %v1508_v49  ;;  %1474 = vrsqrt.f32 %v1986_v31  ;;  %v1457_v60 = vpop.eup %1456 }
 0x115   : > { %v856_v61 = vsel %vm855_vm7, %v1822_v40, %v854_v24  ;;  %v733_v34 = vmul.f32 %v1453_v63, %v1850_v50  ;;  %v2029_v32 = vmax.f32 %v1862_v1, 0.0  ;;  %1476 = vrsqrt.f32 %v1999_v27  ;;  %v1459_v58 = vpop.eup %1458 }
 0x116   : > { %vm736_vm6 = vcmp.eq.f32.partialorder %v1850_v50, 0.0  ;;  %v737_v62 = vand.u32 2147483648, %v1850_v50  ;;  %vm862_vm8 = vcmp.eq.f32.partialorder %v1892_v42, inf  ;;  %1478 = vrsqrt.f32 %v2008_v47  ;;  %v1461_v37 = vpop.eup %1460 }
 0x117   : > { %v1001_v2 = vsub.f32 %v717_v51, %v845_v54  ;;  %v865_v6 = vand.u32 2147483648, %v1892_v42  ;;  %v1083_v59 = vadd.f32 %v2019_v56, %v1082_v9  ;;  %v2039_v1 = vmax.f32 %v1934_v5, 0.0  ;;  %v1463_v7 = vpop.eup %1462 }
 0x118   : > { %v2045_v8 = vsel %vm857_vm15, %v858_v44, %v856_v61  ;;  %v2048_v11 = vsel %vm959_vm10, 1.0, %v1508_v49  ;;  %v740_v14 = vmul.f32 %v1457_v60, %v1882_v43  ;;  %vm741_vm7 = vcmp.eq.f32.partialorder %v1882_v43, inf }
 0x119   : > { %v1465_v15 = vpop.eup %1464  ;;  %v747_v16 = vmul.f32 %v1455_v10, %v1874_v33  ;;  %vm876_vm9 = vcmp.eq.f32.partialorder %v1904_v30, inf  ;;  %v735_v5 = vsel %vm734_vm5, %v1850_v50, %v733_v34  ;;  %v861_v40 = vmul.f32 %v1459_v58, %v1892_v42 }
 0x11a   : > { %1480 = vrsqrt.f32 %v2029_v32  ;;  %v1467_v44 = vpop.eup %1466  ;;  %v875_v17 = vmul.f32 %v1461_v37, %v1904_v30  ;;  %vm864_vm11 = vcmp.eq.f32.partialorder %v1892_v42, 0.0  ;;  %v744_v24 = vand.u32 2147483648, %v1882_v43 }
 0x11b   : > { %vm869_vm14 = vcmp.eq.f32.partialorder %v1924_v35, inf  ;;  %v872_v25 = vand.u32 2147483648, %v1924_v35  ;;  %v1469_v26 = vpop.eup %1468  ;;  %v2064_v63 = vmul.f32 %v1001_v2, %v1001_v2  ;;  %v2067_v9 = vadd.f32 %v1983_v22, %v1083_v59 }
 0x11c   : > { %vm871_vm12 = vcmp.eq.f32.partialorder %v1924_v35, 0.0  ;;  %1482 = vrsqrt.f32 %v2039_v1  ;;  %v731_v10 = vsel %vm729_vm2, %v730_v39, %v728_v21  ;;  %v1471_v51 = vpop.eup %1470  ;;  %v2077_v54 = vsel %vm736_vm6, %v737_v62, %v735_v5 }
 0x11d   : > { %v742_v60 = vsel %vm741_vm7, %v1882_v43, %v740_v14  ;;  %vm748_vm13 = vcmp.eq.f32.partialorder %v1874_v33, inf  ;;  %v754_v61 = vmul.f32 %v1463_v7, %v1911_v55  ;;  %v863_v34 = vsel %vm862_vm8, %v1892_v42, %v861_v40 }
 0x11e   : > { %v882_v48 = vmul.f32 %v1465_v15, %v1917_v20  ;;  %v868_v39 = vmul.f32 %v1467_v44, %v1924_v35  ;;  %v749_v50 = vsel %vm748_vm13, %v1874_v33, %v747_v16  ;;  %vm743_vm15 = vcmp.eq.f32.partialorder %v1882_v43, 0.0 }
 0x11f   : > { %vm750_vm0 = vcmp.eq.f32.partialorder %v1874_v33, 0.0  ;;  %v751_v21 = vand.u32 2147483648, %v1874_v33  ;;  %v761_v58 = vmul.f32 %v1469_v26, %v1932_v36  ;;  %v745_v62 = vsel %vm743_vm15, %v744_v24, %v742_v60 }
 0x120   : > { %vm755_vm1 = vcmp.eq.f32.partialorder %v1911_v55, inf  ;;  %vm757_vm2 = vcmp.eq.f32.partialorder %v1911_v55, 0.0  ;;  %v775_v37 = vmul.f32 %v1471_v51, %v1941_v3  ;;  %v1473_v2 = vpop.eup %1472  ;;  %v758_v43 = vand.u32 2147483648, %v1911_v55 }
 0x121   : > { %v2097_v59 = vsel %vm750_vm0, %v751_v21, %v749_v50  ;;  %v756_v7 = vsel %vm755_vm1, %v1911_v55, %v754_v61  ;;  %vm762_vm4 = vcmp.eq.f32.partialorder %v1932_v36, inf  ;;  %v1475_v14 = vpop.eup %1474  ;;  %v870_v33 = vsel %vm869_vm14, %v1924_v35, %v868_v39 }
 0x122   : > { %vm764_vm3 = vcmp.eq.f32.partialorder %v1932_v36, 0.0  ;;  %v765_v15 = vand.u32 2147483648, %v1932_v36  ;;  %vm769_vm5 = vcmp.eq.f32.partialorder %v1986_v31, inf  ;;  %v1477_v16 = vpop.eup %1476  ;;  %v763_v5 = vsel %vm762_vm4, %v1932_v36, %v761_v58 }
 0x123   : > { %v772_v40 = vand.u32 2147483648, %v1986_v31  ;;  %vm776_vm10 = vcmp.eq.f32.partialorder %v1941_v3, inf  ;;  %v877_v44 = vsel %vm876_vm9, %v1904_v30, %v875_v17  ;;  %v1479_v24 = vpop.eup %1478  ;;  %v759_v26 = vsel %vm757_vm2, %v758_v43, %v756_v7 }
 0x124   : > { %vm771_vm6 = vcmp.eq.f32.partialorder %v1986_v31, 0.0  ;;  %v777_v51 = vsel %vm776_vm10, %v1941_v3, %v775_v37  ;;  %v779_v60 = vand.u32 2147483648, %v1941_v3  ;;  %v866_v61 = vsel %vm864_vm11, %v865_v6, %v863_v34 }
 0x125   : > { %v768_v39 = vmul.f32 %v1475_v14, %v1986_v31  ;;  %v873_v17 = vsel %vm871_vm12, %v872_v25, %v870_v33  ;;  %vm878_vm8 = vcmp.eq.f32.partialorder %v1904_v30, 0.0  ;;  %v889_v55 = vmul.f32 %v1473_v2, %v1973_v18 }
 0x126   : > { %v766_v50 = vsel %vm764_vm3, %v765_v15, %v763_v5  ;;  %v880_v21 = vsel %vm878_vm8, %v879_v38, %v877_v44  ;;  %vm883_vm7 = vcmp.eq.f32.partialorder %v1917_v20, inf  ;;  %v896_v42 = vmul.f32 %v1477_v16, %v1999_v27 }
 0x127   : > { %v1481_v6 = vpop.eup %1480  ;;  %vm778_vm9 = vcmp.eq.f32.partialorder %v1941_v3, 0.0  ;;  %v782_v35 = vmul.f32 %v1479_v24, %v2008_v47  ;;  %vm783_vm11 = vcmp.eq.f32.partialorder %v2008_v47, inf  ;;  %v884_v25 = vsel %vm883_vm7, %v1917_v20, %v882_v48 }
 0x128   : > { %vm885_vm14 = vcmp.eq.f32.partialorder %v1917_v20, 0.0  ;;  %v886_v36 = vand.u32 2147483648, %v1917_v20  ;;  %vm890_vm12 = vcmp.eq.f32.partialorder %v1973_v18, inf  ;;  %vm892_vm13 = vcmp.eq.f32.partialorder %v1973_v18, 0.0 }
 0x129   : > { %v893_v30 = vand.u32 2147483648, %v1973_v18  ;;  %vm897_vm15 = vcmp.eq.f32.partialorder %v1999_v27, inf  ;;  %v1483_v38 = vpop.eup %1482  ;;  %v770_v34 = vsel %vm769_vm5, %v1986_v31, %v768_v39  ;;  %v891_v58 = vsel %vm890_vm12, %v1973_v18, %v889_v55 }
 0x12a   : > { %v1003_v48 = vsub.f32 %v731_v10, %v2045_v8  ;;  %v1047_v37 = vadd.f32 %v1913_v57, %v1837_v52  ;;  %v898_v2 = vsel %vm897_vm15, %v1999_v27, %v896_v42  ;;  %v903_v7 = vmul.f32 %v1481_v6, %v2029_v32 }
 0x12b   : > { %v1004_v43 = vsub.f32 %v2077_v54, %v866_v61  ;;  %v1005_v14 = vsub.f32 %v745_v62, %v873_v17  ;;  %vm928_vm0 = vcmp.gt.f32.partialorder %v1894_v4, 5.3476563  ;;  %vm944_vm1 = vcmp.lt.f32.partialorder %v1894_v4, 470.34766 }
 0x12c   : > { %v1020_v33 = vmul.f32 %v1896_v46, %v1896_v46  ;;  %v1034_v8 = vmul.f32 %v1828_v12, %v1975_v19  ;;  %v1035_v52 = vmul.f32 %v1879_v41, %v2064_v63  ;;  %v1048_v57 = vadd.f32 %v1047_v37, %v1885_v45 }
 0x12d   : > { %v887_v10 = vsel %vm885_vm14, %v886_v36, %v884_v25  ;;  %v894_v54 = vsel %vm892_vm13, %v893_v30, %v891_v58  ;;  %vm899_vm2 = vcmp.eq.f32.partialorder %v1999_v27, 0.0  ;;  %v900_v62 = vand.u32 2147483648, %v1999_v27 }
 0x12e   : > { %v773_v46 = vsel %vm771_vm6, %v772_v40, %v770_v34  ;;  %vm904_vm4 = vcmp.eq.f32.partialorder %v2029_v32, inf  ;;  %v1021_v12 = vmul.f32 %v1003_v48, %v1003_v48  ;;  %v1049_v19 = vadd.f32 %v1048_v57, %v1034_v8 }
 0x12f   : > { %v901_v41 = vsel %vm899_vm2, %v900_v62, %v898_v2  ;;  %v905_v45 = vsel %vm904_vm4, %v2029_v32, %v903_v7  ;;  %v910_v20 = vmul.f32 %v1483_v38, %v2039_v1  ;;  %v1006_v63 = vsub.f32 %v2097_v59, %v880_v21 }
 0x130   : > { %v1022_v18 = vmul.f32 %v1004_v43, %v1004_v43  ;;  %v1023_v15 = vmul.f32 %v1005_v14, %v1005_v14  ;;  %v1036_v16 = vmul.f32 %v1782_v53, %v1020_v33  ;;  %v1050_v5 = vadd.f32 %v1049_v19, %v1035_v52 }
 0x131   : > { %v780_v31 = vsel %vm778_vm9, %v779_v60, %v777_v51  ;;  %v784_v27 = vsel %vm783_vm11, %v2008_v47, %v782_v35  ;;  %vm906_vm3 = vcmp.eq.f32.partialorder %v2029_v32, 0.0  ;;  %v907_v40 = vand.u32 2147483648, %v2029_v32  ;;  %vm960_vm9 = vmand %vm928_vm0, %vm944_vm1 }
 0x132   : > { %vm911_vm5 = vcmp.eq.f32.partialorder %v2039_v1, inf  ;;  %v1007_v44 = vsub.f32 %v759_v26, %v887_v10  ;;  %v1037_v59 = vmul.f32 %v1888_v29, %v1021_v12  ;;  %v1051_v24 = vadd.f32 %v1050_v5, %v1036_v16 }
 0x133   : > { %v908_v61 = vsel %vm906_vm3, %v907_v40, %v905_v45  ;;  %v912_v53 = vsel %vm911_vm5, %v2039_v1, %v910_v20  ;;  %v1008_v39 = vsub.f32 %v766_v50, %v894_v54  ;;  %v1009_v3 = vsub.f32 %v773_v46, %v901_v41 }
 0x134   : > { %v1024_v51 = vmul.f32 %v1006_v63, %v1006_v63  ;;  %v1038_v60 = vmul.f32 %v2003_v28, %v1022_v18  ;;  %v1039_v17 = vmul.f32 %v2019_v56, %v1023_v15  ;;  %v1052_v55 = vadd.f32 %v1051_v24, %v1037_v59 }
 0x135   : > { %vm929_vm10 = vcmp.gt.f32.partialorder %v1959_v13, 5.3476563  ;;  %vm945_vm6 = vcmp.lt.f32.partialorder %v1959_v13, 470.34766  ;;  %v786_v32 = vand.u32 2147483648, %v2008_v47  ;;  %v914_v29 = vand.u32 2147483648, %v2039_v1 }
 0x136   : > { %vm785_vm8 = vcmp.eq.f32.partialorder %v2008_v47, 0.0  ;;  %vm913_vm7 = vcmp.eq.f32.partialorder %v2039_v1, 0.0  ;;  %v1025_v26 = vmul.f32 %v1007_v44, %v1007_v44  ;;  %v1053_v50 = vadd.f32 %v1052_v55, %v1038_v60  ;;  %vm961_vm11 = vmand %vm929_vm10, %vm945_vm6 }
 0x137   : > { %v1085_v28 = vadd.f32 %v2048_v11, %v2067_v9  ;;  %v787_v56 = vsel %vm785_vm8, %v786_v32, %v784_v27  ;;  %v915_v13 = vsel %vm913_vm7, %v914_v29, %v912_v53  ;;  %v1010_v21 = vsub.f32 %v780_v31, %v908_v61 }
 0x138   : > { %v1026_v42 = vmul.f32 %v1008_v39, %v1008_v39  ;;  %v1027_v6 = vmul.f32 %v1009_v3, %v1009_v3  ;;  %v1040_v47 = vmul.f32 %v1983_v22, %v1024_v51  ;;  %v1054_v35 = vadd.f32 %v1053_v50, %v1039_v17 }
 0x139   : > { %vm930_vm14 = vcmp.gt.f32.partialorder %v1852_v23, 5.3476563  ;;  %vm946_vm12 = vcmp.lt.f32.partialorder %v1852_v23, 470.34766  ;;  %v1302_v1 = vsel %vm960_vm9, 1.0, %v1508_v49  ;;  %v1011_v4 = vsub.f32 %v787_v56, %v915_v13 }
 0x13a   : > { %v1041_v25 = vmul.f32 %v2048_v11, %v1025_v26  ;;  %v1055_v36 = vadd.f32 %v1054_v35, %v1040_v47  ;;  %v1086_v9 = vadd.f32 %v1302_v1, %v1085_v28  ;;  %vm931_vm13 = vcmp.gt.f32.partialorder %v1926_v0, 5.3476563  ;;  %vm962_vm0 = vmand %vm930_vm14, %vm946_vm12 }
 0x13b   : > { %vm947_vm15 = vcmp.lt.f32.partialorder %v1926_v0, 470.34766  ;;  %v1303_v30 = vsel %vm961_vm11, 1.0, %v1508_v49  ;;  %v1028_v22 = vmul.f32 %v1010_v21, %v1010_v21  ;;  %v1042_v38 = vmul.f32 %v1302_v1, %v1026_v42 }
 0x13c   : > { %v1043_v34 = vmul.f32 %v1303_v30, %v1027_v6  ;;  %v1056_v58 = vadd.f32 %v1055_v36, %v1041_v25  ;;  %vm963_vm1 = vmand %vm931_vm13, %vm947_vm15  ;;  %v1029_v23 = vmul.f32 %v1011_v4, %v1011_v4  ;;  %v1304_v37 = vsel %vm962_vm0, 1.0, %v1508_v49 }
 0x13d   : > { %v1087_v2 = vadd.f32 %v1303_v30, %v1086_v9  ;;  %v1044_v11 = vmul.f32 %v1304_v37, %v1028_v22  ;;  %v1305_v43 = vsel %vm963_vm1, 1.0, %v1508_v49  ;;  %v1071_v16 = vstv %s1013_s16 }
 0x13e   : > { %v1057_v48 = vadd.f32 %v1056_v58, %v1042_v38  ;;  %v1045_v14 = vmul.f32 %v1305_v43, %v1029_v23  ;;  %vm1073_vm2 = vcmask 0  }
 0x13f   : > { %v1088_v8 = vadd.f32 %v1304_v37, %v1087_v2 }
 0x140   : > { %v1058_v7 = vadd.f32 %v1057_v48, %v1043_v34 }
 0x141   : > { %v1089_v52 = vadd.f32 %v1305_v43, %v1088_v8 }
 0x142   : > { %v1059_v33 = vadd.f32 %v1058_v7, %v1044_v11 }
 0x144   : > { %v1060_v0 = vadd.f32 %v1059_v33, %v1045_v14 }
 0x146   : > { %1061 = vadd.xlane.f32.xlu0 %v1060_v0 }
 0x14a   : > { %1090 = vadd.xlane.f32.xlu0 %v1089_v52 }
 0x1cf   : > { %v1062_v57 = vpop.xlane.xlu0 %1061 }
 0x1d0   : > { %v1063_v10 = vrot.slane %v1062_v57, 4 }
 0x1d2   : > { %v1064_v54 = vadd.f32 %v1063_v10, %v1062_v57 }
 0x1d3   : > { %v1091_v62 = vpop.xlane.xlu0 %1090 }
 0x1d4   : > { %v1065_v46 = vrot.slane %v1064_v54, 2  ;;  %v1092_v12 = vrot.slane %v1091_v62, 4 }
 0x1d6   : > { %v1093_v19 = vadd.f32 %v1092_v12, %v1091_v62  ;;  %v1066_v41 = vadd.f32 %v1065_v46, %v1064_v54 }
 0x1d8   : > { %v1094_v45 = vrot.slane %v1093_v19, 2  ;;  %v1067_v20 = vrot.slane %v1066_v41, 1 }
 0x1da   : > { %v1095_v63 = vadd.f32 %v1094_v45, %v1093_v19  ;;  %v1068_v49 = vadd.f32 %v1067_v20, %v1066_v41 }
 0x1dc   : > { %1371 = vpush %v1068_v49  ;;  %v1096_v18 = vrot.slane %v1095_v63, 1 }
 0x1de   : > { %v1097_v15 = vadd.f32 %v1096_v18, %v1095_v63 }
 0x1e0   : > { %1373 = vpush %v1097_v15 }
 0x20d   : > { %s1372_s17 = spop %1371 }
 0x20e   : > { %v1070_v5 = vstv %s1372_s17 }
 0x20f   : > { %v1072_v31 = vmul.f32 %v1071_v16, %v1070_v5 }
 0x211   : > { %1074 = vst.msk [vmem:[%s262_s20] sm:$0x1] %vm1073_vm2, %v1072_v31  ;;  %s1374_s21 = spop %1373 }
 0x212   : > { %v1099_v27 = vstv %s1374_s21 }
 0x213   : > { %v1100_v40 = vmul.f32 %v1099_v27, %v1071_v16 }
 0x215   : > { %1101 = vst.msk [vmem:[%s268_s26] sm:$0x1] %vm1073_vm2, %v1100_v40 }
 0x216 PF: > { %s18_s24 = sadd.s32 1, %s1506_s24   ;;  %s2243_s22 = smov %s1502_s23 }
 0x217   : > { %p15_p8 = scmp.ge.s32.totalorder %s18_s24, 4   ;;  %s2244_s23 = smov %s2246_s0 }
 0x219   :  { %17 = sbr.rel (!%p15_p8) target bundleno = 3 (0x3), region = 75 }

</bundles_post_ra>
